<compile_context>
chip_gen: v6e
topology: v6e:2x2x1
jax: 0.10.0
libtpu: 0.0.40
codegen_flags: <defaults>
</compile_context>

<pallas_src>
from collections import namedtuple

import numpy as np
import jax
import jax.numpy as jnp
from jax.experimental import pallas as pl
from jax.experimental.pallas import tpu as pltpu

ImageList = namedtuple("ImageList", ["tensors", "image_sizes"])


def _grid_anchors_pallas(base_anchors_np, grid_h, grid_w, stride_h, stride_w):
    """Anchors for one feature level via a lane-dense Pallas kernel.

    base_anchors_np: (A, 4) float32 numpy
    returns: (grid_h * grid_w * A, 4) float32 jax array
    """
    grid_h = int(grid_h)
    grid_w = int(grid_w)
    stride_h = int(stride_h)
    stride_w = int(stride_w)
    A = int(base_anchors_np.shape[0])
    A4 = 4 * A
    w_lane = grid_w * A4  # lane axis of the slab

    # Host-side (compile-time) per-lane constants.
    #   lane L = x*A4 + a*4 + c
    #   slab[y, L] = base[a, c] + (c even ? x*stride_w : y*stride_h)
    lane = np.arange(w_lane, dtype=np.int64)
    x_idx = lane // A4
    c_idx = lane % 4
    base_tiled = np.tile(base_anchors_np.reshape(-1).astype(np.float32), grid_w)
    y_mask = (c_idx % 2 == 1).astype(np.float32)          # 1.0 where c is odd (y coords)
    const_row = (base_tiled + (1.0 - y_mask) * (x_idx * stride_w)).astype(np.float32)
    const_row = const_row[None, :]                         # (1, w_lane)
    y_mask_row = y_mask[None, :].astype(np.float32)        # (1, w_lane)

    # Row tiling: cap each output block at ~2 MiB (double-buffered -> ~4 MiB),
    # safe on v5e (16 MiB scoped default), v6e (32 MiB) and v7x (32 MiB / 64 MiB).
    bytes_per_row = w_lane * 4
    cap_rows = max(8, ((2 << 20) // max(bytes_per_row, 1)) // 8 * 8)
    if grid_h <= cap_rows:
        tile_h = grid_h
        n_tiles = 1
    else:
        tile_h = cap_rows
        n_tiles = -(-grid_h // tile_h)

    def kernel(const_ref, ymask_ref, out_ref):
        th = out_ref.shape[0]
        row0 = pl.program_id(0) * th
        # y (grid row) index per sublane; no div/mod needed.
        y = jax.lax.broadcasted_iota(jnp.int32, (th, 1), 0) + row0
        y_shift = (y * stride_h).astype(jnp.float32)        # (th, 1)
        out_ref[...] = const_ref[...] + y_shift * ymask_ref[...]

    slab = pl.pallas_call(
        kernel,
        out_shape=jax.ShapeDtypeStruct((grid_h, w_lane), jnp.float32),
        grid=(n_tiles,),
        in_specs=[
            pl.BlockSpec((1, w_lane), lambda i: (0, 0)),
            pl.BlockSpec((1, w_lane), lambda i: (0, 0)),
        ],
        out_specs=pl.BlockSpec((tile_h, w_lane), lambda i: (i, 0)),
        compiler_params=pltpu.CompilerParams(
            dimension_semantics=("parallel",),
        ),
    )(jnp.asarray(const_row), jnp.asarray(y_mask_row))

    # (grid_h, grid_w*A*4) -> (grid_h*grid_w*A, 4): flat index
    # y*W*A*4 + x*A*4 + a*4 + c == ((y*W + x)*A + a)*4 + c, i.e. exactly the
    # PyTorch (shifts.view(-1,1,4) + base.view(1,-1,4)).reshape(-1,4) order.
    return slab.reshape(grid_h * grid_w * A, 4)


class AnchorGenerator:
    def __init__(self, sizes, aspect_ratios):
        self.sizes = sizes
        self.aspect_ratios = aspect_ratios
        self.cell_anchors = None
        self._cache = {}  # (grid_sizes, strides) -> concatenated anchors (device array)

    def generate_anchors(self, scales, aspect_ratios):
        # Parameter setup: a handful of values, computed with numpy.
        scales = np.asarray(scales, dtype=np.float32)
        ar = np.asarray(aspect_ratios, dtype=np.float32)
        h_ratios = np.sqrt(ar)
        w_ratios = 1.0 / h_ratios
        ws = (w_ratios[:, None] * scales[None, :]).reshape(-1)
        hs = (h_ratios[:, None] * scales[None, :]).reshape(-1)
        base_anchors = np.stack([-ws, -hs, ws, hs], axis=1) / 2
        # np.round matches torch.round (round-half-to-even)
        return np.round(base_anchors).astype(np.float32)

    def set_cell_anchors(self):
        if self.cell_anchors is not None:
            return self.cell_anchors
        self.cell_anchors = [
            self.generate_anchors(size, ar)
            for size, ar in zip(self.sizes, self.aspect_ratios)
        ]
        return self.cell_anchors

    def num_anchors_per_location(self):
        return [len(s) * len(a) for s, a in zip(self.sizes, self.aspect_ratios)]

    def grid_anchors(self, grid_sizes, strides):
        assert self.cell_anchors is not None
        anchors = []
        for (gh, gw), (sh, sw), base in zip(grid_sizes, strides, self.cell_anchors):
            anchors.append(_grid_anchors_pallas(base, gh, gw, sh, sw))
        return anchors

    def cached_grid_anchors(self, grid_sizes, strides):
        # Anchors are fully determined by static shape metadata -> memoize the
        # concatenated result so the kernel runs once per configuration.
        key = (tuple(grid_sizes), tuple(strides))
        cached = self._cache.get(key)
        if cached is not None:
            return cached
        per_level = self.grid_anchors(grid_sizes, strides)
        all_anchors = jnp.concatenate(per_level, axis=0)
        self._cache[key] = all_anchors
        return all_anchors

    def __call__(self, image_list, feature_maps):
        grid_sizes = [tuple(int(d) for d in fm.shape[-2:]) for fm in feature_maps]
        image_size = image_list.tensors.shape[-2:]
        strides = [
            (int(image_size[0]) // g[0], int(image_size[1]) // g[1])
            for g in grid_sizes
        ]
        self.set_cell_anchors()
        all_anchors = self.cached_grid_anchors(grid_sizes, strides)
        # Identical anchors for every image: reuse the single concatenated array.
        return [all_anchors for _ in range(len(image_list.image_sizes))]


def _reference_anchors_numpy(sizes, aspect_ratios, grid_sizes, image_size):
    """Pure-numpy reference (mirrors the PyTorch module) for verification."""
    per_level = []
    for (scales, ars), (gh, gw) in zip(zip(sizes, aspect_ratios), grid_sizes):
        scales = np.asarray(scales, np.float32)
        ars = np.asarray(ars, np.float32)
        h_ratios = np.sqrt(ars)
        w_ratios = 1.0 / h_ratios
        ws = (w_ratios[:, None] * scales[None, :]).reshape(-1)
        hs = (h_ratios[:, None] * scales[None, :]).reshape(-1)
        base = np.round(np.stack([-ws, -hs, ws, hs], axis=1) / 2)
        sh = image_size[0] // gh
        sw = image_size[1] // gw
        shifts_x = np.arange(0, gw, dtype=np.float32) * sw
        shifts_y = np.arange(0, gh, dtype=np.float32) * sh
        sy, sx = np.meshgrid(shifts_y, shifts_x, indexing="ij")
        sx = sx.reshape(-1)
        sy = sy.reshape(-1)
        shifts = np.stack((sx, sy, sx, sy), axis=1)
        per_level.append(
            (shifts.reshape(-1, 1, 4) + base.reshape(1, -1, 4)).reshape(-1, 4)
        )
    return np.concatenate(per_level, axis=0)


if __name__ == "__main__":
    key = jax.random.PRNGKey(0)
    k1, k2, k3 = jax.random.split(key, 3)

    # Two images, 64x64; two FPN-style feature maps (NCHW), spatial 16 and 8.
    batch, channels = 2, 4
    images = jax.random.normal(k1, (batch, channels, 64, 64), dtype=jnp.float32)
    fmap0 = jax.random.normal(k2, (batch, channels, 16, 16), dtype=jnp.float32)
    fmap1 = jax.random.normal(k3, (batch, channels, 8, 8), dtype=jnp.float32)
    feature_maps = [fmap0, fmap1]
    image_list = ImageList(tensors=images, image_sizes=[(64, 64)] * batch)

    sizes = ((32,), (64,))
    aspect_ratios = ((0.5, 1.0, 2.0), (0.5, 1.0, 2.0))
    gen = AnchorGenerator(sizes, aspect_ratios)

    anchors = gen(image_list, feature_maps)
    anchors = [jax.block_until_ready(a) for a in anchors]

    # Second call hits the cache (no new kernel launches).
    anchors2 = gen(image_list, feature_maps)
    anchors2 = [jax.block_until_ready(a) for a in anchors2]

    # Verify against a pure-numpy reference of the PyTorch semantics.
    ref = _reference_anchors_numpy(
        sizes, aspect_ratios,
        [fm.shape[-2:] for fm in feature_maps],
        images.shape[-2:],
    )
    assert len(anchors) == batch
    for a in anchors + anchors2:
        assert a.shape == ref.shape, (a.shape, ref.shape)
        np.testing.assert_allclose(np.asarray(a), ref, rtol=0, atol=1e-5)

    print("KERNEL_OK")
</pallas_src>

<mosaic_0001>
module attributes {stable_mosaic.version = 11 : i64} {
  func.func @kernel(%arg0: i32, %arg1: memref<1x192xf32, #tpu.memory_space<vmem>>, %arg2: memref<1x192xf32, #tpu.memory_space<vmem>>, %arg3: memref<16x192xf32, #tpu.memory_space<vmem>>) attributes {dimension_semantics = [#tpu.dimension_semantics<parallel>], iteration_bounds = array<i64: 1>, scalar_prefetch = 0 : i64, scratch_operands = 0 : i64, tpu.core_type = #tpu.core_type<tc>, window_params = [{pipeline_mode = #tpu.pipeline_mode<synchronous>, transform_indices = @transform_0, window_bounds = array<i64: 1, 192>}, {pipeline_mode = #tpu.pipeline_mode<synchronous>, transform_indices = @transform_1, window_bounds = array<i64: 1, 192>}, {transform_indices = @transform_2, window_bounds = array<i64: 16, 192>}]} {
    %c16_i32 = arith.constant 16 : i32
    %0 = arith.muli %arg0, %c16_i32 : i32
    %1 = tpu.iota {dimensions = array<i32: 0>} : vector<16x1xi32>
    %2 = vector.broadcast %0 : i32 to vector<16x1xi32>
    %3 = arith.addi %1, %2 : vector<16x1xi32>
    %c4_i32 = arith.constant 4 : i32
    %4 = vector.broadcast %c4_i32 : i32 to vector<16x1xi32>
    %5 = arith.muli %3, %4 : vector<16x1xi32>
    %6 = arith.sitofp %5 : vector<16x1xi32> to vector<16x1xf32>
    %c0 = arith.constant 0 : index
    %c0_0 = arith.constant 0 : index
    %7 = vector.load %arg1[%c0, %c0_0] : memref<1x192xf32, #tpu.memory_space<vmem>>, vector<1x192xf32>
    %c0_1 = arith.constant 0 : index
    %c0_2 = arith.constant 0 : index
    %8 = vector.load %arg2[%c0_1, %c0_2] : memref<1x192xf32, #tpu.memory_space<vmem>>, vector<1x192xf32>
    %9 = vector.broadcast %6 : vector<16x1xf32> to vector<16x192xf32>
    %10 = vector.broadcast %8 : vector<1x192xf32> to vector<16x192xf32>
    %11 = arith.mulf %9, %10 : vector<16x192xf32>
    %12 = vector.broadcast %7 : vector<1x192xf32> to vector<16x192xf32>
    %13 = arith.addf %12, %11 : vector<16x192xf32>
    %c0_3 = arith.constant 0 : index
    %c0_4 = arith.constant 0 : index
    %14 = vector.load %arg3[%c0_3, %c0_4] : memref<16x192xf32, #tpu.memory_space<vmem>>, vector<16x192xf32>
    tpu.vector_store %arg3[%c0_3, %c0_4], %13 {strides = array<i32>} : memref<16x192xf32, #tpu.memory_space<vmem>>, vector<16x192xf32>,
    return
  }
  func.func @transform_0(%arg0: i32) -> (i32, i32) {
    %c0_i32 = arith.constant 0 : i32
    %c0_i32_0 = arith.constant 0 : i32
    %c0_i32_1 = arith.constant 0 : i32
    return %c0_i32, %c0_i32_0 : i32, i32
  }
  func.func @transform_1(%arg0: i32) -> (i32, i32) {
    %c0_i32 = arith.constant 0 : i32
    %c0_i32_0 = arith.constant 0 : i32
    %c0_i32_1 = arith.constant 0 : i32
    return %c0_i32, %c0_i32_0 : i32, i32
  }
  func.func @transform_2(%arg0: i32) -> (i32, i32) {
    %c0_i32 = arith.constant 0 : i32
    %c0_i32_0 = arith.constant 0 : i32
    return %arg0, %c0_i32 : i32, i32
  }
}

</mosaic_0001>

<bundles_post_ra>
// kernel: tpu_custom_call.1
= control target key start
LH: loop header
LB: loop body
LE: loop exit
PB: predicated region body
PF: predicated region fallthrough
CT: control target
= control target key end

     0   :  { %7 = vsyncpa [#allocation3], 0  ;;  %s202_s0 = inlined_call_operand.hbm [shape: f32[1,192], index: 0, kind: input, shape index: {}]   ;;  %s203_s1 = inlined_call_operand.hbm [shape: f32[1,192], index: 1, kind: input, shape index: {}]   ;;  %s204_s2 = inlined_call_operand.hbm [shape: f32[16,192], index: 2, kind: output, shape index: {}]  }
   0x1   :  { %8 = vsyncpa [#allocation6], 0 }
   0x2   :  { %9 = vsyncpa [#allocation4], 0  ;;  %s173_s9 = smov [#allocation2]   ;;  %s174_s11 = smov [#allocation5]  }
   0x3   :  { %s16_s10 = sshll.u32 %s173_s9, 4  ;;  %s26_s12 = sshll.u32 %s174_s11, 4  ;;  %s17_s10 = int_to_ptr.vmem [resolvable:$true] %s16_s10  ;;  %s27_s12 = int_to_ptr.vmem [resolvable:$true] %s26_s12 }
   0x4   :  { %s115_s13 = scalar_lea.vmem %s17_s10, 32  ;;  %p120_p1 = scmp.lt.s32.totalorder %s17_s10, %s17_s10 }
   0x5   :  { %p116_p0 = scmp.ne.s32.totalorder %s17_s10, %s115_s13  ;;  %p121_p2 = scmp.lt.s32.totalorder %s115_s13, %s115_s13 }
   0x7   :  { %p122_p3 = por %p121_p2, %p120_p1 }
   0x9   :  { %p123_p4 = pnand %p122_p3, %p116_p0 }
   0xb   :  { %126 = shalt.err (!%p123_p4)
}
   0xc   :  { %19 = dma.hbm_to_vmem [thread:$0]  %s202_s0, 32, %s17_s10, [#allocation3]  }
   0xd   :  { %s135_s16 = scalar_lea.vmem %s27_s12, 32  ;;  %p140_p6 = scmp.lt.s32.totalorder %s27_s12, %s27_s12 }
   0xe   :  { %p136_p5 = scmp.ne.s32.totalorder %s27_s12, %s135_s16  ;;  %p141_p7 = scmp.lt.s32.totalorder %s135_s16, %s135_s16 }
  0x10   :  { %p142_p8 = por %p141_p7, %p140_p6 }
  0x12   :  { %p143_p9 = pnand %p142_p8, %p136_p5 }
  0x14   :  { %146 = shalt.err (!%p143_p9)
}
  0x15   :  { %29 = dma.hbm_to_vmem [thread:$0]  %s203_s1, 32, %s27_s12, [#allocation6]  }
  0x16   :  { %167 = dma.done.wait [#allocation3], 32  }
  0x17   :  { %168 = vsyncadd [#allocation3], 4294967264 }
  0x18   :  { %169 = dma.done.wait [#allocation6], 32  }
  0x19   :  { %170 = vsyncadd [#allocation6], 4294967264  ;;  %v37_v0 = vlaneseq  ;;  %v47_v8 = vld [vmem:[#allocation2] sm:$0x3]  ;;  %v48_v9 = vld [vmem:[#allocation5] sm:$0x3] }
  0x1a   :  { %s175_s0 = smov [#allocation7]   ;;  %vm80_vm0 = vcmask 523264  }
  0x1b   :  { %v38_v1 = vshrl.u32 %v37_v0, 7  ;;  %s89_s1 = sshll.u32 %s175_s0, 4  ;;  %s90_s1 = int_to_ptr.vmem [resolvable:$true] %s89_s1 }
  0x1c   :  { %s147_s19 = scalar_lea.vmem %s90_s1, 512  ;;  %p152_p11 = scmp.lt.s32.totalorder %s90_s1, %s90_s1 }
  0x1d   :  { %v43_v2 = vmul.u32 4, %v38_v1  ;;  %v52_v3 = vsub.s32 0, %v38_v1  ;;  %v56_v4 = vsub.s32 1, %v38_v1  ;;  %v39_v5 = vadd.s32 8, %v38_v1  ;;  %p148_p10 = scmp.ne.s32.totalorder %s90_s1, %s147_s19  ;;  %p153_p12 = scmp.lt.s32.totalorder %s147_s19, %s147_s19 }
  0x1f   :  { %v45_v6 = vcvt.s32.f32 %v43_v2  ;;  %v44_v7 = vmul.u32 4, %v39_v5  ;;  %v53_v10 = vrot.slane %v48_v9, %v52_v3  ;;  %v57_v11 = vrot.slane %v48_v9, %v56_v4  ;;  %p154_p13 = por %p153_p12, %p152_p11 }
  0x20   :  { %v68_v12 = vrot.slane %v47_v8, %v52_v3  ;;  %v72_v13 = vrot.slane %v47_v8, %v56_v4 }
  0x21   :  { %v46_v14 = vcvt.s32.f32 %v44_v7  ;;  %v60_v15 = vmul.f32 %v53_v10, %v45_v6  ;;  %v61_v16 = vmul.f32 %v57_v11, %v45_v6  ;;  %p155_p0 = pnand %p154_p13, %p148_p10 }
  0x23   :  { %v62_v17 = vmul.f32 %v53_v10, %v46_v14  ;;  %v63_v18 = vmul.f32 %v57_v11, %v46_v14  ;;  %v75_v19 = vadd.f32 %v68_v12, %v60_v15  ;;  %v76_v20 = vadd.f32 %v72_v13, %v61_v16 }
  0x25   :  { %v77_v21 = vadd.f32 %v68_v12, %v62_v17  ;;  %v78_v22 = vadd.f32 %v72_v13, %v63_v18  ;;  %79 = vst [vmem:[#allocation7] sm:$0xff] %v75_v19  ;;  %81 = vst.msk [vmem:[#allocation7 + $0x8] sm:$0xff] %vm80_vm0, %v76_v20 }
  0x27   :  { %82 = vst [vmem:[#allocation7 + $0x10] sm:$0xff] %v77_v21  ;;  %83 = vst.msk [vmem:[#allocation7 + $0x18] sm:$0xff] %vm80_vm0, %v78_v22 }
  0x28   :  { %158 = shalt.err (!%p155_p0)
}
  0x29   :  { %s176_s20 = smov 256   ;;  %s177_s21 = smov 16  }
  0x2a   :  { %95 = dma.vmem_to_hbm [thread:$0]  %s90_s1, 512, %s204_s2, [#allocation4], %s176_s20, %s176_s20, %s177_s21  }
  0x2b   :  { %171 = dma.done.wait [#allocation4], 512  }
  0x2c   :  { %172 = vsyncadd [#allocation4], 4294966784 }
  0x2d   :  { %99 = vsyncpa [#allocation3], 1 }
  0x2e   :  { %100 = vsyncpa [#allocation6], 1 }
  0x2f   :  { %101 = vsyncpa [#allocation4], 1 }

</bundles_post_ra>
